<compile_context>
chip_gen: v5e
topology: v5e:2x2
jax: 0.10.0
libtpu: 0.0.40
codegen_flags: <defaults>
</compile_context>

<pallas_src>
from functools import partial

import jax
import jax.numpy as jnp
import numpy as np
from jax import lax
from jax.experimental import pallas as pl
from jax.experimental.pallas import tpu as pltpu


def _private_block_kernel(x_ref, wb1_ref, t1_ref, wb2_ref, t2_ref, o_ref):
    # x_ref  : (NB, H, WC)   lane-packed input block (NB images)
    # wb*    : (WC, 3*WC)    bf16 banded weights, 3 vertical taps concatenated on lanes
    #                        (kw taps + W zero-padding + BN scale baked in)
    # t*     : (1, WC)       folded shift (BN shift + scaled conv bias), f32
    # o_ref  : (NB, H, WC)
    NB, H, WC = o_ref.shape
    R = NB * H
    x = x_ref[...].reshape(R, WC)                               # f32, lane-dense

    # Edge predicates for SAME padding in H (hoisted once, reused by both convs).
    row = lax.broadcasted_iota(jnp.int32, (R, WC), 0)
    h_in_img = row % H
    not_top = h_in_img != 0
    not_bot = h_in_img != (H - 1)

    def conv_bn_relu(inp, wb_ref, t_ref):
        # One MXU matmul against the fused 3-band RHS; BN scale & conv bias are
        # already folded into wb / t by prepare_params.
        u = jnp.dot(inp.astype(jnp.bfloat16), wb_ref[...],
                    preferred_element_type=jnp.float32)         # (R, 3*WC) f32
        u0 = u[:, :WC]          # vertical tap kh=0 (input row h-1 contribution)
        u1 = u[:, WC:2 * WC]    # kh=1 (same row)
        u2 = u[:, 2 * WC:]      # kh=2 (input row h+1 contribution)
        # out[h] = u0[h-1] + u1[h] + u2[h+1]; rows outside each image -> zero.
        d0 = jnp.where(not_top, pltpu.roll(u0, shift=1, axis=0), 0.0)
        d2 = jnp.where(not_bot, pltpu.roll(u2, shift=R - 1, axis=0), 0.0)
        return jnp.maximum(u1 + d0 + d2 + t_ref[...], 0.0)

    y1 = conv_bn_relu(x, wb1_ref, t1_ref)                       # conv1 + BN1 + ReLU
    y2 = conv_bn_relu(y1, wb2_ref, t2_ref)                      # conv2 + BN2 + ReLU
    o_ref[...] = jnp.maximum(y2 + x, 0.0).reshape(NB, H, WC).astype(o_ref.dtype)


def _banded_weights(w_hwio, W):
    """w_hwio: (3, 3, C, C) HWIO conv weight.

    Returns (3, W*C, W*C): for each vertical tap kh, a banded matrix B with
    B[wi*C + ci, w*C + co] = w_hwio[kh, kw, ci, co] where wi == w + kw - 1 and
    0 <= wi < W (the kw taps laid out on the band, W zero-padding baked in).
    """
    C = w_hwio.shape[2]
    sel = np.zeros((3, W, W), np.float32)
    for kw in range(3):
        for w in range(W):
            wi = w + kw - 1
            if 0 <= wi < W:
                sel[kw, wi, w] = 1.0
    band = jnp.einsum("dab,kdij->kaibj", jnp.asarray(sel), w_hwio)  # (3,W,C,W,C)
    return band.reshape(3, W * C, W * C)


def prepare_params(params, W):
    """One-time prep (outside the per-call path): fold BN scale into the conv weights
    and the conv bias into the BN shift, build bf16 banded (WC, 3*WC) RHS per conv,
    pack shifts lane-dense."""
    C = params["w1"].shape[2]
    WC = W * C

    def fold(w_hwio, b, s, t):
        w_scaled = w_hwio * s                      # scale output channels: s * conv(x)
        shift = t + s * b                          # s*(conv(x)+b)+t = scaled_conv + shift
        wb = _banded_weights(w_scaled, W)          # (3, WC, WC) f32
        wb_cat = jnp.concatenate([wb[0], wb[1], wb[2]], axis=-1)   # (WC, 3*WC)
        return wb_cat.astype(jnp.bfloat16), jnp.tile(shift, W).reshape(1, WC)

    wb1, t1 = fold(params["w1"], params["b1"], params["s1"], params["t1"])
    wb2, t2 = fold(params["w2"], params["b2"], params["s2"], params["t2"])
    return {"wb1": wb1, "t1": t1, "wb2": wb2, "t2": t2}


@partial(jax.jit, static_argnames=("grid_steps",))
def private_block_pallas(x_nhwc, prepped, *, grid_steps=1):
    """x_nhwc: (N, H, W, C) float32. Returns (N, H, W, C) float32."""
    N, H, W, C = x_nhwc.shape
    WC = W * C
    if WC % 128 != 0:
        raise ValueError("lane-dense layout requires W*C to be a multiple of 128")
    if N % grid_steps != 0:
        raise ValueError("grid_steps must divide the batch size")
    NB = N // grid_steps
    x_packed = x_nhwc.reshape(N, H, WC)                         # channels onto lanes

    const = lambda shape: pl.BlockSpec(shape, lambda n: (0,) * len(shape))

    grid_spec = pltpu.PrefetchScalarGridSpec(
        num_scalar_prefetch=0,
        grid=(grid_steps,),
        in_specs=[
            pl.BlockSpec((NB, H, WC), lambda n: (n, 0, 0)),     # x (lane-dense)
            const((WC, 3 * WC)),                                # wb1 (bf16, BN folded)
            const((1, WC)),                                     # t1
            const((WC, 3 * WC)),                                # wb2
            const((1, WC)),                                     # t2
        ],
        out_specs=pl.BlockSpec((NB, H, WC), lambda n: (n, 0, 0)),
    )

    out = pl.pallas_call(
        _private_block_kernel,
        out_shape=jax.ShapeDtypeStruct((N, H, WC), jnp.float32),
        grid_spec=grid_spec,
        compiler_params=pltpu.CompilerParams(
            dimension_semantics=("parallel",)),
    )(x_packed, prepped["wb1"], prepped["t1"], prepped["wb2"], prepped["t2"])

    return out.reshape(N, H, W, C)


def make_params(key, C, eps=1e-5):
    """Deterministic parameter init matching PrivateBlock(out_channel=C) shapes."""
    ks = jax.random.split(key, 8)
    fan_in = C * 3 * 3
    bound = 1.0 / np.sqrt(fan_in)

    def conv_w(k):  # PyTorch (C_out, C_in, 3, 3) -> HWIO (3, 3, C_in, C_out)
        w_oihw = jax.random.uniform(k, (C, C, 3, 3), jnp.float32, -bound, bound)
        return jnp.transpose(w_oihw, (2, 3, 1, 0))

    w1 = conv_w(ks[0])
    b1 = jax.random.uniform(ks[1], (C,), jnp.float32, -bound, bound)
    w2 = conv_w(ks[2])
    b2 = jax.random.uniform(ks[3], (C,), jnp.float32, -bound, bound)

    # BatchNorm (eval-mode): gamma, beta, running_mean, running_var folded to scale/shift.
    def bn(kg, kb):
        gamma = 1.0 + 0.1 * jax.random.normal(kg, (C,), jnp.float32)
        beta = 0.1 * jax.random.normal(kb, (C,), jnp.float32)
        mean = 0.05 * jnp.arange(C, dtype=jnp.float32)
        var = 1.0 + 0.02 * jnp.arange(C, dtype=jnp.float32)
        scale = gamma * lax.rsqrt(var + eps)
        shift = beta - mean * scale
        return scale, shift

    s1, t1 = bn(ks[4], ks[5])
    s2, t2 = bn(ks[6], ks[7])

    return {"w1": w1, "b1": b1, "s1": s1, "t1": t1,
            "w2": w2, "b2": b2, "s2": s2, "t2": t2}


def private_block_ref(x_nhwc, p):
    """Pure-JAX reference (lax conv, f32 everywhere) for correctness check."""
    def conv(x, w, b):
        y = lax.conv_general_dilated(
            x, w, window_strides=(1, 1), padding="SAME",
            dimension_numbers=("NHWC", "HWIO", "NHWC"))
        return y + b.reshape(1, 1, 1, -1)

    y = conv(x_nhwc, p["w1"], p["b1"])
    y = jnp.maximum(y * p["s1"] + p["t1"], 0.0)
    y = conv(y, p["w2"], p["b2"])
    y = jnp.maximum(y * p["s2"] + p["t2"], 0.0)
    return jnp.maximum(y + x_nhwc, 0.0)


if __name__ == "__main__":
    N, C, H, W = 2, 8, 16, 16  # PyTorch input NCHW = (2, 8, 16, 16); W*C = 128 lanes
    key = jax.random.PRNGKey(0)
    kx, kp = jax.random.split(key)

    x_nchw = jax.random.normal(kx, (N, C, H, W), jnp.float32)
    x_nhwc = jnp.transpose(x_nchw, (0, 2, 3, 1))  # NCHW -> NHWC for the kernel

    params = make_params(kp, C)
    prepped = prepare_params(params, W)           # one-time weight prep, outside the hot path

    # grid_steps=2 -> one image per step, shards across v7x's two TensorCores while
    # keeping overhead negligible elsewhere; set grid_steps=1 on single-TC v5e/v6e to
    # process all N*H rows in a single step (both paths supported by the kernel).
    grid_steps = 2 if N % 2 == 0 else 1
    out = jax.block_until_ready(
        private_block_pallas(x_nhwc, prepped, grid_steps=grid_steps))

    ref = jax.block_until_ready(private_block_ref(x_nhwc, params))
    # bf16 matmul operands (f32 accumulation) -> slightly relaxed tolerance vs pure f32.
    np.testing.assert_allclose(np.asarray(out), np.asarray(ref), rtol=2e-2, atol=2e-2)

    print("KERNEL_OK")
</pallas_src>

<mosaic_0001>
module attributes {stable_mosaic.version = 11 : i64} {
  func.func @_private_block_kernel(%arg0: i32, %arg1: memref<1x16x128xf32, #tpu.memory_space<vmem>>, %arg2: memref<128x384xbf16, #tpu.memory_space<vmem>>, %arg3: memref<1x128xf32, #tpu.memory_space<vmem>>, %arg4: memref<128x384xbf16, #tpu.memory_space<vmem>>, %arg5: memref<1x128xf32, #tpu.memory_space<vmem>>, %arg6: memref<1x16x128xf32, #tpu.memory_space<vmem>>) attributes {dimension_semantics = [#tpu.dimension_semantics<parallel>], iteration_bounds = array<i64: 2>, scalar_prefetch = 0 : i64, scratch_operands = 0 : i64, tpu.core_type = #tpu.core_type<tc>, window_params = [{transform_indices = @transform_0, window_bounds = array<i64: 1, 16, 128>}, {pipeline_mode = #tpu.pipeline_mode<synchronous>, transform_indices = @transform_1, window_bounds = array<i64: 128, 384>}, {pipeline_mode = #tpu.pipeline_mode<synchronous>, transform_indices = @transform_2, window_bounds = array<i64: 1, 128>}, {pipeline_mode = #tpu.pipeline_mode<synchronous>, transform_indices = @transform_3, window_bounds = array<i64: 128, 384>}, {pipeline_mode = #tpu.pipeline_mode<synchronous>, transform_indices = @transform_4, window_bounds = array<i64: 1, 128>}, {transform_indices = @transform_5, window_bounds = array<i64: 1, 16, 128>}]} {
    %c0 = arith.constant 0 : index
    %c0_0 = arith.constant 0 : index
    %c0_1 = arith.constant 0 : index
    %0 = vector.load %arg1[%c0, %c0_0, %c0_1] : memref<1x16x128xf32, #tpu.memory_space<vmem>>, vector<1x16x128xf32>
    %1 = vector.shape_cast %0 : vector<1x16x128xf32> to vector<16x128xf32>
    %2 = tpu.iota {dimensions = array<i32: 0>} : vector<16x128xi32>
    %c16_i32 = arith.constant 16 : i32
    %c0_i32 = arith.constant 0 : i32
    %3 = arith.cmpi eq, %c16_i32, %c0_i32 : i32
    %c1_i32 = arith.constant 1 : i32
    %4 = arith.select %3, %c1_i32, %c16_i32 : i32
    %5 = vector.broadcast %4 : i32 to vector<16x128xi32>
    %6 = arith.remsi %2, %5 : vector<16x128xi32>
    %c0_i32_2 = arith.constant 0 : i32
    %7 = vector.broadcast %c0_i32_2 : i32 to vector<16x128xi32>
    %8 = arith.cmpi ne, %6, %7 : vector<16x128xi32>
    %c0_i32_3 = arith.constant 0 : i32
    %9 = vector.broadcast %c0_i32_3 : i32 to vector<16x128xi32>
    %10 = arith.cmpi slt, %6, %9 : vector<16x128xi32>
    %c0_i32_4 = arith.constant 0 : i32
    %11 = arith.cmpi slt, %4, %c0_i32_4 : i32
    %12 = vector.broadcast %11 : i1 to vector<16x128xi1>
    %13 = vector.broadcast %12 : vector<16x128xi1> to vector<16x128xi1>
    %14 = arith.xori %10, %13 : vector<16x128xi1>
    %15 = arith.andi %14, %8 : vector<16x128xi1>
    %16 = vector.broadcast %4 : i32 to vector<16x128xi32>
    %17 = arith.addi %6, %16 : vector<16x128xi32>
    %18 = arith.select %15, %17, %6 : vector<16x128xi1>, vector<16x128xi32>
    %c0_i32_5 = arith.constant 0 : i32
    %19 = vector.broadcast %c0_i32_5 : i32 to vector<16x128xi32>
    %20 = arith.cmpi ne, %18, %19 : vector<16x128xi32>
    %c15_i32 = arith.constant 15 : i32
    %21 = vector.broadcast %c15_i32 : i32 to vector<16x128xi32>
    %22 = arith.cmpi ne, %18, %21 : vector<16x128xi32>
    %23 = arith.truncf %1 : vector<16x128xf32> to vector<16x128xbf16>
    %c0_6 = arith.constant 0 : index
    %c0_7 = arith.constant 0 : index
    %24 = vector.load %arg2[%c0_6, %c0_7] : memref<128x384xbf16, #tpu.memory_space<vmem>>, vector<128x384xbf16>
    %cst = arith.constant dense<0.000000e+00> : vector<16x384xf32>
    %25 = tpu.matmul %23, %24, %cst {dimension_numbers = #tpu.dot_dimension_numbers<[1], [0], [0], [1], [0, 0, 1, 1], [], []>} : vector<16x128xbf16>, vector<128x384xbf16>, vector<16x384xf32> -> vector<16x384xf32>
    %26 = vector.extract_strided_slice %25 {offsets = [0, 0], sizes = [16, 128], strides = [1, 1]} : vector<16x384xf32> to vector<16x128xf32>
    %27 = vector.extract_strided_slice %25 {offsets = [0, 128], sizes = [16, 128], strides = [1, 1]} : vector<16x384xf32> to vector<16x128xf32>
    %28 = vector.extract_strided_slice %25 {offsets = [0, 256], sizes = [16, 128], strides = [1, 1]} : vector<16x384xf32> to vector<16x128xf32>
    %c1_i32_8 = arith.constant 1 : i32
    %29 = tpu.dynamic_rotate %26 by %c1_i32_8 dim 0 : vector<16x128xf32>, i32 -> vector<16x128xf32>
    %cst_9 = arith.constant 0.000000e+00 : f32
    %30 = vector.broadcast %cst_9 : f32 to vector<16x128xf32>
    %31 = arith.select %20, %29, %30 : vector<16x128xi1>, vector<16x128xf32>
    %c15_i32_10 = arith.constant 15 : i32
    %32 = tpu.dynamic_rotate %28 by %c15_i32_10 dim 0 : vector<16x128xf32>, i32 -> vector<16x128xf32>
    %cst_11 = arith.constant 0.000000e+00 : f32
    %33 = vector.broadcast %cst_11 : f32 to vector<16x128xf32>
    %34 = arith.select %22, %32, %33 : vector<16x128xi1>, vector<16x128xf32>
    %35 = arith.addf %27, %31 : vector<16x128xf32>
    %36 = arith.addf %35, %34 : vector<16x128xf32>
    %c0_12 = arith.constant 0 : index
    %c0_13 = arith.constant 0 : index
    %37 = vector.load %arg3[%c0_12, %c0_13] : memref<1x128xf32, #tpu.memory_space<vmem>>, vector<1x128xf32>
    %38 = vector.broadcast %37 : vector<1x128xf32> to vector<16x128xf32>
    %39 = arith.addf %36, %38 : vector<16x128xf32>
    %cst_14 = arith.constant 0.000000e+00 : f32
    %40 = vector.broadcast %cst_14 : f32 to vector<16x128xf32>
    %41 = arith.maximumf %39, %40 : vector<16x128xf32>
    %42 = arith.truncf %41 : vector<16x128xf32> to vector<16x128xbf16>
    %c0_15 = arith.constant 0 : index
    %c0_16 = arith.constant 0 : index
    %43 = vector.load %arg4[%c0_15, %c0_16] : memref<128x384xbf16, #tpu.memory_space<vmem>>, vector<128x384xbf16>
    %cst_17 = arith.constant dense<0.000000e+00> : vector<16x384xf32>
    %44 = tpu.matmul %42, %43, %cst_17 {dimension_numbers = #tpu.dot_dimension_numbers<[1], [0], [0], [1], [0, 0, 1, 1], [], []>} : vector<16x128xbf16>, vector<128x384xbf16>, vector<16x384xf32> -> vector<16x384xf32>
    %45 = vector.extract_strided_slice %44 {offsets = [0, 0], sizes = [16, 128], strides = [1, 1]} : vector<16x384xf32> to vector<16x128xf32>
    %46 = vector.extract_strided_slice %44 {offsets = [0, 128], sizes = [16, 128], strides = [1, 1]} : vector<16x384xf32> to vector<16x128xf32>
    %47 = vector.extract_strided_slice %44 {offsets = [0, 256], sizes = [16, 128], strides = [1, 1]} : vector<16x384xf32> to vector<16x128xf32>
    %c1_i32_18 = arith.constant 1 : i32
    %48 = tpu.dynamic_rotate %45 by %c1_i32_18 dim 0 : vector<16x128xf32>, i32 -> vector<16x128xf32>
    %cst_19 = arith.constant 0.000000e+00 : f32
    %49 = vector.broadcast %cst_19 : f32 to vector<16x128xf32>
    %50 = arith.select %20, %48, %49 : vector<16x128xi1>, vector<16x128xf32>
    %c15_i32_20 = arith.constant 15 : i32
    %51 = tpu.dynamic_rotate %47 by %c15_i32_20 dim 0 : vector<16x128xf32>, i32 -> vector<16x128xf32>
    %cst_21 = arith.constant 0.000000e+00 : f32
    %52 = vector.broadcast %cst_21 : f32 to vector<16x128xf32>
    %53 = arith.select %22, %51, %52 : vector<16x128xi1>, vector<16x128xf32>
    %54 = arith.addf %46, %50 : vector<16x128xf32>
    %55 = arith.addf %54, %53 : vector<16x128xf32>
    %c0_22 = arith.constant 0 : index
    %c0_23 = arith.constant 0 : index
    %56 = vector.load %arg5[%c0_22, %c0_23] : memref<1x128xf32, #tpu.memory_space<vmem>>, vector<1x128xf32>
    %57 = vector.broadcast %56 : vector<1x128xf32> to vector<16x128xf32>
    %58 = arith.addf %55, %57 : vector<16x128xf32>
    %cst_24 = arith.constant 0.000000e+00 : f32
    %59 = vector.broadcast %cst_24 : f32 to vector<16x128xf32>
    %60 = arith.maximumf %58, %59 : vector<16x128xf32>
    %61 = arith.addf %60, %1 : vector<16x128xf32>
    %cst_25 = arith.constant 0.000000e+00 : f32
    %62 = vector.broadcast %cst_25 : f32 to vector<16x128xf32>
    %63 = arith.maximumf %61, %62 : vector<16x128xf32>
    %64 = vector.shape_cast %63 : vector<16x128xf32> to vector<1x16x128xf32>
    %c0_26 = arith.constant 0 : index
    %c0_27 = arith.constant 0 : index
    %c0_28 = arith.constant 0 : index
    %65 = vector.load %arg6[%c0_26, %c0_27, %c0_28] : memref<1x16x128xf32, #tpu.memory_space<vmem>>, vector<1x16x128xf32>
    tpu.vector_store %arg6[%c0_26, %c0_27, %c0_28], %64 {strides = array<i32>} : memref<1x16x128xf32, #tpu.memory_space<vmem>>, vector<1x16x128xf32>,
    return
  }
  func.func @transform_0(%arg0: i32) -> (i32, i32, i32) {
    %c0_i32 = arith.constant 0 : i32
    %c0_i32_0 = arith.constant 0 : i32
    %c0_i32_1 = arith.constant 0 : i32
    return %arg0, %c0_i32, %c0_i32_0 : i32, i32, i32
  }
  func.func @transform_1(%arg0: i32) -> (i32, i32) {
    %c0_i32 = arith.constant 0 : i32
    %c0_i32_0 = arith.constant 0 : i32
    %c0_i32_1 = arith.constant 0 : i32
    return %c0_i32, %c0_i32_0 : i32, i32
  }
  func.func @transform_2(%arg0: i32) -> (i32, i32) {
    %c0_i32 = arith.constant 0 : i32
    %c0_i32_0 = arith.constant 0 : i32
    %c0_i32_1 = arith.constant 0 : i32
    return %c0_i32, %c0_i32_0 : i32, i32
  }
  func.func @transform_3(%arg0: i32) -> (i32, i32) {
    %c0_i32 = arith.constant 0 : i32
    %c0_i32_0 = arith.constant 0 : i32
    %c0_i32_1 = arith.constant 0 : i32
    return %c0_i32, %c0_i32_0 : i32, i32
  }
  func.func @transform_4(%arg0: i32) -> (i32, i32) {
    %c0_i32 = arith.constant 0 : i32
    %c0_i32_0 = arith.constant 0 : i32
    %c0_i32_1 = arith.constant 0 : i32
    return %c0_i32, %c0_i32_0 : i32, i32
  }
  func.func @transform_5(%arg0: i32) -> (i32, i32, i32) {
    %c0_i32 = arith.constant 0 : i32
    %c0_i32_0 = arith.constant 0 : i32
    %c0_i32_1 = arith.constant 0 : i32
    return %arg0, %c0_i32, %c0_i32_0 : i32, i32, i32
  }
}

</mosaic_0001>

<bundles_post_ra>
// kernel: private_block_pallas.1
= control target key start
LH: loop header
LB: loop body
LE: loop exit
PB: predicated region body
PF: predicated region fallthrough
CT: control target
= control target key end

     0   :  { %s1076_s18 = smov 0   ;;  %s1430_s0 = inlined_call_operand.vmem [shape: f32[2,16,128], index: 0, kind: input, shape index: {}]   ;;  %s1431_s1 = inlined_call_operand.vmem [shape: bf16[128,384], index: 1, kind: input, shape index: {}]   ;;  %s1432_s2 = inlined_call_operand.vmem [shape: f32[1,128], index: 2, kind: input, shape index: {}]   ;;  %s1433_s3 = inlined_call_operand.vmem [shape: bf16[128,384], index: 3, kind: input, shape index: {}]   ;;  %s1434_s4 = inlined_call_operand.vmem [shape: f32[1,128], index: 4, kind: input, shape index: {}]   ;;  %s1435_s5 = inlined_call_operand.vmem [shape: f32[2,16,128], index: 5, kind: output, shape index: {}]  }
   0x1 LB: > { %s775_s19 = sadd.s32 4294967295, %s1044_s18   ;;  %p779_p0 = scmp.ge.s32.totalorder %s1044_s18, 1  ;;  %s1044_s18 = sphi %s1076_s18, %s15_s18  }
   0x2   : > { %p187_p1 = scmp.lt.s32.totalorder %s1044_s18, 3 }
   0x4   : > { %p188_p2 = pnand %p779_p0, %p187_p1 }
   0x5   : > { %p215_p3 = scmp.lt.s32.totalorder (!%p188_p2), %s775_s19, 1 }
   0x6   : > { %191 = sbr.rel (%p188_p2) target bundleno = 356 (0x164), region = 40 }
   0xb   : > { %v870_v0 = vld [vmem:[%s1431_s1 + $0xa8] sm:$0xf]  ;;  %v1002_v1 = vld [vmem:[%s1431_s1 + $0xb0] sm:$0xf0]  ;;  %v1001_v2 = vld [vmem:[%s1431_s1 + $0xac] sm:$0xf] }
   0xc   : > { %v871_v3 = vor.u32 %v1002_v1, %v870_v0  ;;  %v872_v4 = vld [vmem:[%s1431_s1 + $0xb4] sm:$0xf0]  ;;  %v878_v5 = vld [vmem:[%s1431_s1 + $0xb0] sm:$0xf]  ;;  %v1003_v6 = vld [vmem:[%s1431_s1 + $0xb8] sm:$0xf0] }
   0xd   : > { %v875_v7 = vor.u32 %v1001_v2, %v872_v4  ;;  %v879_v8 = vor.u32 %v1003_v6, %v878_v5  ;;  %v858_v9 = vld [vmem:[%s1431_s1 + $0x90] sm:$0xf]  ;;  %v999_v10 = vld [vmem:[%s1431_s1 + $0x98] sm:$0xf0]  ;;  %v998_v11 = vld [vmem:[%s1431_s1 + $0x94] sm:$0xf] }
   0xe   : > { %419 = vmatpush.bf16.msra.mxu0 %v871_v3  ;;  %v859_v12 = vor.u32 %v999_v10, %v858_v9  ;;  %v860_v13 = vld [vmem:[%s1431_s1 + $0x9c] sm:$0xf0]  ;;  %v866_v14 = vld [vmem:[%s1431_s1 + $0x98] sm:$0xf]  ;;  %v1000_v15 = vld [vmem:[%s1431_s1 + $0xa0] sm:$0xf0] }
   0xf   : > { %433 = vmatpush.bf16.msra.mxu1 %v875_v7  ;;  %447 = vmatpush.bf16.msra.mxu2 %v879_v8  ;;  %v863_v16 = vor.u32 %v998_v11, %v860_v13  ;;  %v867_v17 = vor.u32 %v1000_v15, %v866_v14  ;;  %v846_v18 = vld [vmem:[%s1431_s1 + $0x78] sm:$0xf]  ;;  %v996_v19 = vld [vmem:[%s1431_s1 + $0x80] sm:$0xf0]  ;;  %v995_v20 = vld [vmem:[%s1431_s1 + $0x7c] sm:$0xf] }
  0x10   : > { %v848_v21 = vld [vmem:[%s1431_s1 + $0x84] sm:$0xf0]  ;;  %v854_v22 = vld [vmem:[%s1431_s1 + $0x80] sm:$0xf]  ;;  %v997_v23 = vld [vmem:[%s1431_s1 + $0x88] sm:$0xf0]  ;;  %v847_v24 = vor.u32 %v996_v19, %v846_v18 }
  0x11   : > { %v851_v25 = vor.u32 %v995_v20, %v848_v21  ;;  %v855_v26 = vor.u32 %v997_v23, %v854_v22  ;;  %v834_v27 = vld [vmem:[%s1431_s1 + $0x60] sm:$0xf]  ;;  %v993_v28 = vld [vmem:[%s1431_s1 + $0x68] sm:$0xf0]  ;;  %v992_v29 = vld [vmem:[%s1431_s1 + $0x64] sm:$0xf] }
  0x12   : > { %420 = vmatpush.bf16.msra.mxu0 %v859_v12  ;;  %v836_v30 = vld [vmem:[%s1431_s1 + $0x6c] sm:$0xf0]  ;;  %v842_v31 = vld [vmem:[%s1431_s1 + $0x68] sm:$0xf]  ;;  %v994_v32 = vld [vmem:[%s1431_s1 + $0x70] sm:$0xf0]  ;;  %v835_v33 = vor.u32 %v993_v28, %v834_v27 }
  0x13   : > { %434 = vmatpush.bf16.msra.mxu1 %v863_v16  ;;  %448 = vmatpush.bf16.msra.mxu2 %v867_v17  ;;  %v839_v34 = vor.u32 %v992_v29, %v836_v30  ;;  %v843_v35 = vor.u32 %v994_v32, %v842_v31  ;;  %v822_v36 = vld [vmem:[%s1431_s1 + $0x48] sm:$0xf]  ;;  %v990_v37 = vld [vmem:[%s1431_s1 + $0x50] sm:$0xf0]  ;;  %v989_v38 = vld [vmem:[%s1431_s1 + $0x4c] sm:$0xf] }
  0x14   : > { %v824_v39 = vld [vmem:[%s1431_s1 + $0x54] sm:$0xf0]  ;;  %v830_v40 = vld [vmem:[%s1431_s1 + $0x50] sm:$0xf]  ;;  %v991_v41 = vld [vmem:[%s1431_s1 + $0x58] sm:$0xf0]  ;;  %v823_v42 = vor.u32 %v990_v37, %v822_v36 }
  0x15   : > { %v810_v43 = vld [vmem:[%s1431_s1 + $0x30] sm:$0xf]  ;;  %v987_v44 = vld [vmem:[%s1431_s1 + $0x38] sm:$0xf0]  ;;  %v986_v45 = vld [vmem:[%s1431_s1 + $0x34] sm:$0xf]  ;;  %v827_v46 = vor.u32 %v989_v38, %v824_v39  ;;  %v831_v47 = vor.u32 %v991_v41, %v830_v40 }
  0x16   : > { %421 = vmatpush.bf16.msra.mxu0 %v847_v24  ;;  %v966_v48 = vld [vmem:[%s1433_s3 + $0xa8] sm:$0xf]  ;;  %v1026_v49 = vld [vmem:[%s1433_s3 + $0xb0] sm:$0xf0]  ;;  %v812_v50 = vld [vmem:[%s1431_s1 + $0x3c] sm:$0xf0]  ;;  %v811_v54 = vor.u32 %v987_v44, %v810_v43 }
  0x17   : > { %435 = vmatpush.bf16.msra.mxu1 %v851_v25  ;;  %449 = vmatpush.bf16.msra.mxu2 %v855_v26  ;;  %v818_v51 = vld [vmem:[%s1431_s1 + $0x38] sm:$0xf]  ;;  %v988_v52 = vld [vmem:[%s1431_s1 + $0x40] sm:$0xf0]  ;;  %v967_v53 = vor.u32 %v1026_v49, %v966_v48  ;;  %s1441_s19 = smov (!%p215_p3, %s775_s19), 1  ;;  %v815_v56 = vor.u32 %v986_v45, %v812_v50 }
  0x18   : > { %v798_v55 = vld [vmem:[%s1431_s1 + $0x18] sm:$0xf]  ;;  %v819_v57 = vor.u32 %v988_v52, %v818_v51  ;;  %v984_v58 = vld [vmem:[%s1431_s1 + $0x20] sm:$0xf0]  ;;  %v983_v59 = vld [vmem:[%s1431_s1 + $0x1c] sm:$0xf] }
  0x19   : > { %648 = vmatpush.bf16.msra.mxu3 %v967_v53  ;;  %v800_v60 = vld [vmem:[%s1431_s1 + $0x24] sm:$0xf0]  ;;  %v806_v61 = vld [vmem:[%s1431_s1 + $0x20] sm:$0xf]  ;;  %v985_v62 = vld [vmem:[%s1431_s1 + $0x28] sm:$0xf0]  ;;  %v799_v63 = vor.u32 %v984_v58, %v798_v55 }
  0x1a   : > { %422 = vmatpush.bf16.msra.mxu0 %v835_v33  ;;  %s978_s14 = sshll.u32 %s1441_s19, 4  ;;  %v786_v0 = vld [vmem:[%s1431_s1] sm:$0xf]  ;;  %v803_v1 = vor.u32 %v983_v59, %v800_v60  ;;  %v807_v2 = vor.u32 %v985_v62, %v806_v61  ;;  %v981_v3 = vld [vmem:[%s1431_s1 + $0x8] sm:$0xf0] }
  0x1b   : > { %436 = vmatpush.bf16.msra.mxu1 %v839_v34  ;;  %450 = vmatpush.bf16.msra.mxu2 %v843_v35  ;;  %v980_v4 = vld [vmem:[%s1431_s1 + $0x4] sm:$0xf]  ;;  %v788_v5 = vld [vmem:[%s1431_s1 + $0xc] sm:$0xf0]  ;;  %s219_s27 = scalar_lea.vmem %s1430_s0, %s978_s14  ;;  %v794_v6 = vld [vmem:[%s1431_s1 + $0x8] sm:$0xf]  ;;  %v787_v12 = vor.u32 %v981_v3, %v786_v0  ;;  %s224_s20 = scalar_lea.vmem %s1435_s5, %s978_s14 }
  0x1c   : > { %v982_v7 = vld [vmem:[%s1431_s1 + $0x10] sm:$0xf0]  ;;  %v1025_v8 = vld [vmem:[%s1433_s3 + $0xac] sm:$0xf]  ;;  %v968_v9 = vld [vmem:[%s1433_s3 + $0xb4] sm:$0xf0]  ;;  %v791_v15 = vor.u32 %v980_v4, %v788_v5 }
  0x1d   : > { %v974_v10 = vld [vmem:[%s1433_s3 + $0xb0] sm:$0xf]  ;;  %v1027_v11 = vld [vmem:[%s1433_s3 + $0xb8] sm:$0xf0]  ;;  %v1258_v13 = vld [vmem:[%s219_s27] sm:$0xff]  ;;  %v795_v16 = vor.u32 %v982_v7, %v794_v6  ;;  %v971_v17 = vor.u32 %v1025_v8, %v968_v9 }
  0x1e   : > { %423 = vmatpush.bf16.msra.mxu0 %v823_v42  ;;  %v1260_v14 = vld [vmem:[%s219_s27 + $0x8] sm:$0xff]  ;;  %v975_v18 = vor.u32 %v1027_v11, %v974_v10  ;;  %v954_v20 = vld [vmem:[%s1433_s3 + $0x90] sm:$0xf]  ;;  %v1023_v21 = vld [vmem:[%s1433_s3 + $0x98] sm:$0xf0] }
  0x1f   : > { %437 = vmatpush.bf16.msra.mxu1 %v827_v46  ;;  %451 = vmatpush.bf16.msra.mxu2 %v831_v47  ;;  %v258_v19 = vpack.c.bf16 %v1260_v14, %v1258_v13  ;;  %v1022_v22 = vld [vmem:[%s1433_s3 + $0x94] sm:$0xf]  ;;  %v955_v23 = vor.u32 %v1023_v21, %v954_v20  ;;  %v956_v24 = vld [vmem:[%s1433_s3 + $0x9c] sm:$0xf0]  ;;  %v962_v25 = vld [vmem:[%s1433_s3 + $0x98] sm:$0xf]  ;;  %v227_v21 = vlaneseq }
  0x20   : > { %v1024_v26 = vld [vmem:[%s1433_s3 + $0xa0] sm:$0xf0]  ;;  %v959_v27 = vor.u32 %v1022_v22, %v956_v24  ;;  %v942_v29 = vld [vmem:[%s1433_s3 + $0x78] sm:$0xf]  ;;  %v1019_v31 = vld [vmem:[%s1433_s3 + $0x7c] sm:$0xf] }
  0x21   : > { %v963_v28 = vor.u32 %v1024_v26, %v962_v25  ;;  %649 = vmatpush.bf16.msra.mxu3 %v955_v23  ;;  %v1020_v30 = vld [vmem:[%s1433_s3 + $0x80] sm:$0xf0]  ;;  %v944_v33 = vld [vmem:[%s1433_s3 + $0x84] sm:$0xf0]  ;;  %v950_v34 = vld [vmem:[%s1433_s3 + $0x80] sm:$0xf] }
  0x22   : > { %424 = vmatpush.bf16.msra.mxu0 %v811_v54  ;;  %v943_v32 = vor.u32 %v1020_v30, %v942_v29  ;;  %v1021_v35 = vld [vmem:[%s1433_s3 + $0x88] sm:$0xf0]  ;;  %v947_v36 = vor.u32 %v1019_v31, %v944_v33  ;;  %v930_v38 = vld [vmem:[%s1433_s3 + $0x60] sm:$0xf]  ;;  %v1016_v40 = vld [vmem:[%s1433_s3 + $0x64] sm:$0xf] }
  0x23   : > { %438 = vmatpush.bf16.msra.mxu1 %v815_v56  ;;  %452 = vmatpush.bf16.msra.mxu2 %v819_v57  ;;  %v951_v37 = vor.u32 %v1021_v35, %v950_v34  ;;  %v1017_v39 = vld [vmem:[%s1433_s3 + $0x68] sm:$0xf0]  ;;  %v932_v42 = vld [vmem:[%s1433_s3 + $0x6c] sm:$0xf0]  ;;  %v938_v43 = vld [vmem:[%s1433_s3 + $0x68] sm:$0xf] }
  0x24   : > { %v931_v41 = vor.u32 %v1017_v39, %v930_v38  ;;  %v1018_v44 = vld [vmem:[%s1433_s3 + $0x70] sm:$0xf0]  ;;  %v935_v45 = vor.u32 %v1016_v40, %v932_v42  ;;  %v918_v47 = vld [vmem:[%s1433_s3 + $0x48] sm:$0xf]  ;;  %v1013_v50 = vld [vmem:[%s1433_s3 + $0x4c] sm:$0xf] }
  0x25   : > { %650 = vmatpush.bf16.msra.mxu3 %v943_v32  ;;  %v939_v46 = vor.u32 %v1018_v44, %v938_v43  ;;  %v1014_v48 = vld [vmem:[%s1433_s3 + $0x50] sm:$0xf0]  ;;  %v920_v51 = vld [vmem:[%s1433_s3 + $0x54] sm:$0xf0]  ;;  %v926_v52 = vld [vmem:[%s1433_s3 + $0x50] sm:$0xf] }
  0x26   : > { %425 = vmatpush.bf16.msra.mxu0 %v799_v63  ;;  %v919_v49 = vor.u32 %v1014_v48, %v918_v47  ;;  %v923_v53 = vor.u32 %v1013_v50, %v920_v51  ;;  %v1015_v54 = vld [vmem:[%s1433_s3 + $0x58] sm:$0xf0]  ;;  %v906_v56 = vld [vmem:[%s1433_s3 + $0x30] sm:$0xf]  ;;  %v1010_v58 = vld [vmem:[%s1433_s3 + $0x34] sm:$0xf] }
  0x27   : > { %439 = vmatpush.bf16.msra.mxu1 %v803_v1  ;;  %453 = vmatpush.bf16.msra.mxu2 %v807_v2  ;;  %v927_v55 = vor.u32 %v1015_v54, %v926_v52  ;;  %v1011_v57 = vld [vmem:[%s1433_s3 + $0x38] sm:$0xf0]  ;;  %v908_v60 = vld [vmem:[%s1433_s3 + $0x3c] sm:$0xf0]  ;;  %v914_v61 = vld [vmem:[%s1433_s3 + $0x38] sm:$0xf] }
  0x28   : > { %v907_v59 = vor.u32 %v1011_v57, %v906_v56  ;;  %v911_v62 = vor.u32 %v1010_v58, %v908_v60  ;;  %v1012_v63 = vld [vmem:[%s1433_s3 + $0x40] sm:$0xf0]  ;;  %v894_v1 = vld [vmem:[%s1433_s3 + $0x18] sm:$0xf]  ;;  %v1007_v3 = vld [vmem:[%s1433_s3 + $0x1c] sm:$0xf] }
  0x29   : > { %651 = vmatpush.bf16.msra.mxu3 %v931_v41  ;;  %v915_v0 = vor.u32 %v1012_v63, %v914_v61  ;;  %v1008_v2 = vld [vmem:[%s1433_s3 + $0x20] sm:$0xf0]  ;;  %v896_v5 = vld [vmem:[%s1433_s3 + $0x24] sm:$0xf0]  ;;  %v902_v6 = vld [vmem:[%s1433_s3 + $0x20] sm:$0xf] }
  0x2a   : > { %426 = vmatpush.bf16.msra.mxu0 %v787_v12  ;;  %v895_v4 = vor.u32 %v1008_v2, %v894_v1  ;;  %v1009_v7 = vld [vmem:[%s1433_s3 + $0x28] sm:$0xf0]  ;;  %v899_v8 = vor.u32 %v1007_v3, %v896_v5  ;;  %v882_v10 = vld [vmem:[%s1433_s3] sm:$0xf]  ;;  %v1004_v12 = vld [vmem:[%s1433_s3 + $0x4] sm:$0xf] }
  0x2b   : > { %440 = vmatpush.bf16.msra.mxu1 %v791_v15  ;;  %454 = vmatpush.bf16.msra.mxu2 %v795_v16  ;;  %v903_v9 = vor.u32 %v1009_v7, %v902_v6  ;;  %v1005_v11 = vld [vmem:[%s1433_s3 + $0x8] sm:$0xf0]  ;;  %v884_v16 = vld [vmem:[%s1433_s3 + $0xc] sm:$0xf0]  ;;  %v228_v23 = vshrl.u32 %v227_v21, 7 }
  0x2c   : > { %v883_v15 = vor.u32 %v1005_v11, %v882_v10  ;;  %v1036_v42 = vld [vmem:[%s1432_s2] ss:$0 sm:$0xff] }
  0x2d   : > { %427 = vmatmul.bf16.vlgmr.msra.gmra.mxu0 %v258_v19  ;;  %652 = vmatpush.bf16.msra.mxu3 %v919_v49  ;;  %v234_v26 = vand.u32 15, %v228_v23  ;;  %vm463_vm0 = vcmp.lt.s32.totalorder %v228_v23, 1  ;;  %vm470_vm2 = vcmp.lt.s32.totalorder %v228_v23, 7  ;;  %v1037_v5 = vld [vmem:[%s1434_s4] ss:$0 sm:$0xff] }
  0x2e   : > { %662 = vmatpush.bf16.msrb.mxu0 %v971_v17  ;;  %441 = vmatmul.bf16.vlgmr.msra.gmra.mxu1 %v258_v19  ;;  %v890_v17 = vld [vmem:[%s1433_s3 + $0x8] sm:$0xf] }
  0x2f   : > { %676 = vmatpush.bf16.msrb.mxu1 %v975_v18  ;;  %455 = vmatmul.bf16.vlgmr.msra.gmra.mxu2 %v258_v19  ;;  %v1006_v18 = vld [vmem:[%s1433_s3 + $0x10] sm:$0xf0]  ;;  %v887_v19 = vor.u32 %v1004_v12, %v884_v16  ;;  %vm1390_vm1 = vcmp.ne.s32.totalorder %v234_v26, 0 }
  0x30   : > { %v891_v20 = vor.u32 %v1006_v18, %v890_v17 }
  0x31   : > { %653 = vmatpush.bf16.msra.mxu3 %v907_v59 }
  0x32   : > { %663 = vmatpush.bf16.msrb.mxu0 %v959_v27 }
  0x33   : > { %677 = vmatpush.bf16.msrb.mxu1 %v963_v28  ;;  %v229_v28 = vadd.s32 8, %v228_v23 }
  0x35   : > { %654 = vmatpush.bf16.msra.mxu3 %v895_v4  ;;  %v241_v33 = vand.u32 15, %v229_v28 }
  0x36   : > { %664 = vmatpush.bf16.msrb.mxu0 %v947_v36 }
  0x37   : > { %678 = vmatpush.bf16.msrb.mxu1 %v951_v37  ;;  %vm1398_vm3 = vcmp.ne.s32.totalorder %v241_v33, 15 }
  0x39   : > { %655 = vmatpush.bf16.msra.mxu3 %v883_v15 }
  0x3a   : > { %665 = vmatpush.bf16.msrb.mxu0 %v935_v45 }
  0x3b   : > { %679 = vmatpush.bf16.msrb.mxu1 %v939_v46 }
  0x3e   : > { %666 = vmatpush.bf16.msrb.mxu0 %v923_v53 }
  0x3f   : > { %680 = vmatpush.bf16.msrb.mxu1 %v927_v55 }
  0x42   : > { %667 = vmatpush.bf16.msrb.mxu0 %v911_v62 }
  0x43   : > { %681 = vmatpush.bf16.msrb.mxu1 %v915_v0 }
  0x46   : > { %668 = vmatpush.bf16.msrb.mxu0 %v899_v8 }
  0x47   : > { %682 = vmatpush.bf16.msrb.mxu1 %v903_v9 }
  0x4a   : > { %669 = vmatpush.bf16.msrb.mxu0 %v887_v19 }
  0x4b   : > { %683 = vmatpush.bf16.msrb.mxu1 %v891_v20 }
  0xaa   : > { %v428_v22 = vpop.f32.mrf.mxu0 }
  0xab   : > { %v442_v24 = vpop.f32.mrf.mxu1  ;;  %v461_v29 = vrot.slane %v428_v22, 7 }
  0xb2   : > { %v456_v25 = vpop.f32.mrf.mxu2  ;;  %v430_v27 = vpop.f32.mrf.mxu0 }
  0xb3   : > { %v462_v30 = vrot.slane %v430_v27, 7  ;;  %v468_v37 = vrot.slane %v456_v25, 1  ;;  %v444_v41 = vpop.f32.mrf.mxu1 }
  0xb5   : > { %v465_v32 = vsel %vm463_vm0, %v462_v30, %v461_v29  ;;  %v464_v35 = vsel %vm463_vm0, %v461_v29, %v462_v30 }
  0xb6   : > { %v466_v34 = vsel %vm1390_vm1, %v465_v32, 0.0  ;;  %v476_v43 = vadd.f32 %v464_v35, %v444_v41 }
  0xb7   : > { %v475_v40 = vadd.f32 %v466_v34, %v442_v24 }
  0xba   : > { %v458_v36 = vpop.f32.mrf.mxu2 }
  0xbb   : > { %v469_v39 = vrot.slane %v458_v36, 1 }
  0xbd   : > { %v471_v44 = vsel %vm470_vm2, %v468_v37, %v469_v39  ;;  %v472_v45 = vsel %vm470_vm2, %v469_v39, %v468_v37 }
  0xbe   : > { %v474_v46 = vsel %vm1398_vm3, %v472_v45, 0.0  ;;  %v477_v47 = vadd.f32 %v475_v40, %v471_v44 }
  0xbf   : > { %v478_v48 = vadd.f32 %v476_v43, %v474_v46 }
  0xc0   : > { %v483_v49 = vadd.f32 %v1036_v42, %v477_v47 }
  0xc1   : > { %v484_v50 = vadd.f32 %v1036_v42, %v478_v48 }
  0xc2   : > { %v485_v51 = vmax.f32 %v483_v49, 0.0 }
  0xc3   : > { %v486_v52 = vmax.f32 %v484_v50, 0.0 }
  0xc5   : > { %v487_v53 = vpack.c.bf16 %v486_v52, %v485_v51 }
  0xc7   : > { %656 = vmatmul.bf16.vlgmr.msra.gmra.mxu3 %v487_v53  ;;  %670 = vmatmul.bf16.vlgmr.msrb.gmra.mxu0 %v487_v53 }
  0xc8   : > { %684 = vmatmul.bf16.vlgmr.msrb.gmra.mxu1 %v487_v53 }
 0x144   : > { %v671_v56 = vpop.f32.mrf.mxu0 }
 0x145   : > { %v685_v54 = vpop.f32.mrf.mxu1 }
 0x146   : > { %v696_v59 = vrot.slane %v685_v54, 1 }
 0x14a   : > { %v657_v55 = vpop.f32.mrf.mxu3 }
 0x14b   : > { %v690_v61 = vrot.slane %v657_v55, 7 }
 0x14c   : > { %v673_v0 = vpop.f32.mrf.mxu0 }
 0x14d   : > { %v687_v57 = vpop.f32.mrf.mxu1 }
 0x14e   : > { %v697_v58 = vrot.slane %v687_v57, 1 }
 0x150   : > { %v699_v63 = vsel %vm470_vm2, %v697_v58, %v696_v59  ;;  %v698_v8 = vsel %vm470_vm2, %v696_v59, %v697_v58 }
 0x151   : > { %v701_v6 = vsel %vm1398_vm3, %v699_v63, 0.0 }
 0x152   : > { %v659_v60 = vpop.f32.mrf.mxu3 }
 0x153   : > { %v691_v62 = vrot.slane %v659_v60, 7 }
 0x155   : > { %v692_v1 = vsel %vm463_vm0, %v690_v61, %v691_v62  ;;  %v693_v2 = vsel %vm463_vm0, %v691_v62, %v690_v61 }
 0x156   : > { %v694_v3 = vsel %vm1390_vm1, %v693_v2, 0.0  ;;  %v703_v4 = vadd.f32 %v692_v1, %v673_v0 }
 0x157   : > { %v702_v7 = vadd.f32 %v694_v3, %v671_v56 }
 0x158   : > { %v705_v9 = vadd.f32 %v703_v4, %v701_v6 }
 0x159   : > { %v704_v10 = vadd.f32 %v702_v7, %v698_v8 }
 0x15a   : > { %v711_v11 = vadd.f32 %v1037_v5, %v705_v9 }
 0x15b   : > { %v710_v12 = vadd.f32 %v1037_v5, %v704_v10 }
 0x15c   : > { %v713_v15 = vmax.f32 %v711_v11, 0.0 }
 0x15d   : > { %v712_v16 = vmax.f32 %v710_v12, 0.0 }
 0x15e   : > { %v715_v17 = vadd.f32 %v713_v15, %v1260_v14 }
 0x15f   : > { %v714_v18 = vadd.f32 %v712_v16, %v1258_v13 }
 0x160   : > { %v717_v19 = vmax.f32 %v715_v17, 0.0 }
 0x161   : > { %v716_v20 = vmax.f32 %v714_v18, 0.0 }
 0x162   : > { %719 = vst [vmem:[%s224_s20 + $0x8] sm:$0xff] %v717_v19 }
 0x163   : > { %718 = vst [vmem:[%s224_s20] sm:$0xff] %v716_v20 }
 0x164 PF: > { %s15_s18 = sadd.s32 1, %s1044_s18  }
 0x165   : > { %p12_p4 = scmp.ge.s32.totalorder %s15_s18, 4  }
 0x167   :  { %14 = sbr.rel (!%p12_p4) target bundleno = 1 (0x1), region = 70 }

</bundles_post_ra>
